<compile_context>
chip_gen: v6e
topology: v6e:2x2x1
jax: 0.10.0
libtpu: 0.0.40
codegen_flags: <defaults>
</compile_context>

<pallas_src>
import functools

import jax
import jax.numpy as jnp
from jax.experimental import pallas as pl
from jax.experimental.pallas import tpu as pltpu


def _linear_tanh_kernel(x_ref, w_ref, b_ref, o_ref):
    # x_ref : (TM, F)  features row-tile (VMEM, f32)
    # w_ref : (F, 2)   [w_hi | w_lo] f32 columns (VMEM); w_hi+w_lo == torch W^T
    # b_ref : (1, 1)   bias (SMEM, read as a scalar)
    # o_ref : (1, TM)  lane-dense output row-tile (VMEM)
    x = x_ref[...]                                        # (TM, F) f32
    w_pair = w_ref[...].astype(jnp.bfloat16)              # (F, 2) bf16 [hi | lo]
    w_hi = w_pair[:, 0:1]                                  # (F, 1) bf16

    # bf16 hi/lo split of the activations (x_lo is exact in f32; its bf16
    # rounding is ~2^-26 relative -> negligible).
    x_hi = x.astype(jnp.bfloat16)                          # (TM, F) bf16
    x_lo = (x - x_hi.astype(jnp.float32)).astype(jnp.bfloat16)

    # Two native bf16 MXU passes; f32 accumulation.
    part = jnp.dot(x_hi, w_pair, preferred_element_type=jnp.float32)   # (TM, 2)
    corr = jnp.dot(x_lo, w_hi, preferred_element_type=jnp.float32)     # (TM, 1)
    acc = part[:, 0:1] + part[:, 1:2] + corr               # (TM, 1) f32

    acc_row = jnp.transpose(acc)                           # (1, TM) lane-dense (XLU)
    b = b_ref[0, 0]                                        # scalar from SMEM
    o_ref[...] = jnp.tanh(acc_row + b).astype(o_ref.dtype)


def _round_up(x, n):
    return ((x + n - 1) // n) * n


@functools.partial(jax.jit, static_argnames=("tile_m",))
def linear_predictor_forward(features, weight_t, bias, *, tile_m=8192):
    """features: (..., F); weight_t: (F, 1); bias: (1, 1). Returns (..., 1)."""
    orig_shape = features.shape
    in_features = orig_shape[-1]
    x2d = features.reshape(-1, in_features)
    m = x2d.shape[0]

    # hi/lo split of the tiny weight, done once outside the kernel.
    w_f32 = weight_t.astype(jnp.float32)
    w_hi = w_f32.astype(jnp.bfloat16).astype(jnp.float32)
    w_lo = w_f32 - w_hi
    w_pair = jnp.concatenate([w_hi, w_lo], axis=1)          # (F, 2) f32

    # ---- tile-size selection ------------------------------------------------
    tile_m = max(128, _round_up(int(tile_m), 128))           # requested cap
    m_pad = _round_up(m, 8)
    # Target >= ~8 grid steps on large inputs (shards across v7x's 2 TCs and
    # keeps the double-buffered pipeline overlapping), but keep tiles >= 4096
    # rows so the ~0.35us per-step overhead stays amortized.
    tm = min(tile_m, max(4096, _round_up(pl.cdiv(m, 8), 128)))
    tm = max(8, min(tm, m_pad))                               # never exceed padded m
    grid = pl.cdiv(m, tm)

    # ---- explicit VMEM budget (so v5e's 16 MiB default scoped limit doesn't
    # silently shrink buffering, and v7x's 64 MiB physical isn't exceeded) ----
    feat_tile = tm * 128 * 4            # lane-padded f32 feature tile
    out_tile = 8 * tm * 4               # (1, tm) output pads to 8 sublanes
    vmem_budget = (2 * feat_tile        # double-buffered feature stream
                   + 3 * feat_tile      # hi/lo-split temporaries + slack
                   + 2 * out_tile
                   + (2 << 20))         # weight / bias / compiler scratch headroom
    vmem_limit = int(min(max(vmem_budget, 16 << 20), 48 << 20))

    out_padded = pl.pallas_call(
        _linear_tanh_kernel,
        out_shape=jax.ShapeDtypeStruct((1, grid * tm), features.dtype),
        grid_spec=pltpu.PrefetchScalarGridSpec(
            num_scalar_prefetch=0,
            grid=(grid,),
            in_specs=[
                # Features: row tiles; ragged last block handled by Pallas.
                pl.BlockSpec((tm, in_features), lambda i: (i, 0)),
                # Weight pair (F, 2): constant block, fetched once.
                pl.BlockSpec((in_features, 2), lambda i: (0, 0)),
                # Bias: whole (1,1) array lives in SMEM as a scalar.
                pl.BlockSpec(memory_space=pltpu.MemorySpace.SMEM),
            ],
            # Lane-dense output: block i writes columns [i*tm, (i+1)*tm).
            out_specs=pl.BlockSpec((1, tm), lambda i: (0, i)),
        ),
        compiler_params=pltpu.CompilerParams(
            dimension_semantics=("parallel",),   # shards rows across v7x's 2 TCs
            vmem_limit_bytes=vmem_limit,
        ),
    )(x2d, w_pair, bias)

    # Output is tiny (4 B/row vs 132 B/row of input) -> negligible extra traffic.
    out = out_padded[0, :m]
    return out.reshape(orig_shape[:-1] + (1,))


def init_params(key, node_embsize):
    """Deterministic init matching nn.Linear(node_embsize*2 + 1, 1) shapes."""
    in_features = node_embsize * 2 + 1
    k_w, k_b = jax.random.split(key)
    bound = 1.0 / jnp.sqrt(in_features)
    # torch nn.Linear weight: (out=1, in); we store transposed (in, 1).
    weight_t = jax.random.uniform(
        k_w, (in_features, 1), jnp.float32, -bound, bound
    )
    bias = jax.random.uniform(k_b, (1, 1), jnp.float32, -bound, bound)
    return weight_t, bias


if __name__ == "__main__":
    node_embsize = 16                      # config['node_embsize']
    in_features = node_embsize * 2 + 1     # 33

    key = jax.random.PRNGKey(0)
    k_params, k_x1, k_x2, k_x3 = jax.random.split(key, 4)
    weight_t, bias = init_params(k_params, node_embsize)

    def reference(x):
        # Exact f32 elementwise reference (no matmul-precision ambiguity).
        return jnp.tanh(
            jnp.sum(x * weight_t[:, 0], axis=-1, keepdims=True) + bias[0, 0]
        )

    # 1) Tiny single-tile case: batch=2, 8 edges each, feature dim 33.
    feats1 = jax.random.normal(k_x1, (2, 8, in_features), jnp.float32)
    out1 = jax.block_until_ready(
        linear_predictor_forward(feats1, weight_t, bias)
    )
    assert out1.shape == (2, 8, 1), out1.shape
    err1 = float(jnp.max(jnp.abs(out1 - reference(feats1))))
    assert err1 < 1e-4, err1

    # 2) Multi-tile + ragged-last-block path with a small explicit tile
    #    (m = 510 rows, tile_m = 256 -> grid of 2 with a 2-row ragged tail).
    feats2 = jax.random.normal(k_x2, (3, 170, in_features), jnp.float32)
    out2 = jax.block_until_ready(
        linear_predictor_forward(feats2, weight_t, bias, tile_m=256)
    )
    assert out2.shape == (3, 170, 1), out2.shape
    err2 = float(jnp.max(jnp.abs(out2 - reference(feats2))))
    assert err2 < 1e-4, err2

    # 3) Default-tile path: m = 4800 rows -> tm = 4096, grid = 2 with a
    #    704-row ragged tail (exercises the new tile/VMEM heuristics).
    feats3 = jax.random.normal(k_x3, (8, 600, in_features), jnp.float32)
    out3 = jax.block_until_ready(
        linear_predictor_forward(feats3, weight_t, bias)
    )
    assert out3.shape == (8, 600, 1), out3.shape
    err3 = float(jnp.max(jnp.abs(out3 - reference(feats3))))
    assert err3 < 1e-4, err3

    print("KERNEL_OK")
</pallas_src>

<mosaic_0001>
module attributes {stable_mosaic.version = 11 : i64} {
  func.func @_linear_tanh_kernel(%arg0: i32, %arg1: memref<16x33xf32, #tpu.memory_space<vmem>>, %arg2: memref<33x2xf32, #tpu.memory_space<vmem>>, %arg3: memref<1x1xf32, #tpu.memory_space<smem>>, %arg4: memref<1x16xf32, #tpu.memory_space<vmem>>) attributes {dimension_semantics = [#tpu.dimension_semantics<parallel>], iteration_bounds = array<i64: 1>, scalar_prefetch = 0 : i64, scratch_operands = 0 : i64, tpu.core_type = #tpu.core_type<tc>, window_params = [{transform_indices = @transform_0, window_bounds = array<i64: 16, 33>}, {pipeline_mode = #tpu.pipeline_mode<synchronous>, transform_indices = @transform_1, window_bounds = array<i64: 33, 2>}, {transform_indices = @transform_2, window_bounds = array<i64: 1, 1>}, {transform_indices = @transform_3, window_bounds = array<i64: 1, 16>}]} {
    %c0 = arith.constant 0 : index
    %c0_0 = arith.constant 0 : index
    %0 = vector.load %arg1[%c0, %c0_0] : memref<16x33xf32, #tpu.memory_space<vmem>>, vector<16x33xf32>
    %c0_1 = arith.constant 0 : index
    %c0_2 = arith.constant 0 : index
    %1 = vector.load %arg2[%c0_1, %c0_2] : memref<33x2xf32, #tpu.memory_space<vmem>>, vector<33x2xf32>
    %2 = arith.truncf %1 : vector<33x2xf32> to vector<33x2xbf16>
    %3 = vector.extract_strided_slice %2 {offsets = [0, 0], sizes = [33, 1], strides = [1, 1]} : vector<33x2xbf16> to vector<33x1xbf16>
    %4 = arith.truncf %0 : vector<16x33xf32> to vector<16x33xbf16>
    %5 = arith.extf %4 : vector<16x33xbf16> to vector<16x33xf32>
    %6 = arith.subf %0, %5 : vector<16x33xf32>
    %7 = arith.truncf %6 : vector<16x33xf32> to vector<16x33xbf16>
    %cst = arith.constant dense<0.000000e+00> : vector<16x2xf32>
    %8 = tpu.matmul %4, %2, %cst {dimension_numbers = #tpu.dot_dimension_numbers<[1], [0], [0], [1], [0, 0, 1, 1], [], []>} : vector<16x33xbf16>, vector<33x2xbf16>, vector<16x2xf32> -> vector<16x2xf32>
    %cst_3 = arith.constant dense<0.000000e+00> : vector<16x1xf32>
    %9 = tpu.matmul %7, %3, %cst_3 {dimension_numbers = #tpu.dot_dimension_numbers<[1], [0], [0], [1], [0, 0, 1, 1], [], []>} : vector<16x33xbf16>, vector<33x1xbf16>, vector<16x1xf32> -> vector<16x1xf32>
    %10 = vector.extract_strided_slice %8 {offsets = [0, 0], sizes = [16, 1], strides = [1, 1]} : vector<16x2xf32> to vector<16x1xf32>
    %11 = vector.extract_strided_slice %8 {offsets = [0, 1], sizes = [16, 1], strides = [1, 1]} : vector<16x2xf32> to vector<16x1xf32>
    %12 = arith.addf %10, %11 : vector<16x1xf32>
    %13 = arith.addf %12, %9 : vector<16x1xf32>
    %14 = tpu.transpose %13, [1, 0] : vector<16x1xf32> -> vector<1x16xf32>
    %c0_4 = arith.constant 0 : index
    %c0_5 = arith.constant 0 : index
    %15 = memref.load %arg3[%c0_4, %c0_5] : memref<1x1xf32, #tpu.memory_space<smem>>
    %16 = vector.broadcast %15 : f32 to vector<1x16xf32>
    %17 = arith.addf %14, %16 : vector<1x16xf32>
    %18 = math.tanh %17 : vector<1x16xf32>
    %c0_6 = arith.constant 0 : index
    %c0_7 = arith.constant 0 : index
    %19 = vector.load %arg4[%c0_6, %c0_7] : memref<1x16xf32, #tpu.memory_space<vmem>>, vector<1x16xf32>
    tpu.vector_store %arg4[%c0_6, %c0_7], %18 {strides = array<i32>} : memref<1x16xf32, #tpu.memory_space<vmem>>, vector<1x16xf32>,
    return
  }
  func.func @transform_0(%arg0: i32) -> (i32, i32) {
    %c0_i32 = arith.constant 0 : i32
    %c0_i32_0 = arith.constant 0 : i32
    return %arg0, %c0_i32 : i32, i32
  }
  func.func @transform_1(%arg0: i32) -> (i32, i32) {
    %c0_i32 = arith.constant 0 : i32
    %c0_i32_0 = arith.constant 0 : i32
    %c0_i32_1 = arith.constant 0 : i32
    return %c0_i32, %c0_i32_0 : i32, i32
  }
  func.func @transform_2(%arg0: i32) -> (i32, i32) {
    %c0_i32 = arith.constant 0 : i32
    %c0_i32_0 = arith.constant 0 : i32
    %c0_i32_1 = arith.constant 0 : i32
    return %c0_i32, %c0_i32_0 : i32, i32
  }
  func.func @transform_3(%arg0: i32) -> (i32, i32) {
    %c0_i32 = arith.constant 0 : i32
    %c0_i32_0 = arith.constant 0 : i32
    return %c0_i32, %arg0 : i32, i32
  }
}

</mosaic_0001>

<bundles_post_ra>
// kernel: squeeze.1
= control target key start
LH: loop header
LB: loop body
LE: loop exit
PB: predicated region body
PF: predicated region fallthrough
CT: control target
= control target key end

     0   :  { %s77_s0 = inlined_call_operand.vmem [shape: f32[16], index: 0, kind: input, shape index: {}]   ;;  %s78_s1 = inlined_call_operand.hbm [shape: f32[2,8,1], index: 1, kind: output, shape index: {}]  }
   0x1   :  { %v6_v0 = vld [vmem:[%s77_s0] sm:$0x1] }
   0x2   :  { %2 = vsyncpa [#allocation1], 0  ;;  %7 = vst [vmem:[#allocation3] sm:$0x1] %v6_v0  ;;  %vm9_vm0 = vcmask 64512   ;;  %s59_s0 = smov 120  }
   0x3   :  { %s60_s8 = smov [#allocation0]  }
   0x4   :  { %s29_s9 = sshll.u32 %s60_s8, 4  ;;  %s30_s9 = int_to_ptr.vmem [resolvable:$true] %s29_s9 }
   0x5   :  { %s37_s10 = scalar_lea.vmem %s30_s9, 32  ;;  %p42_p1 = scmp.lt.s32.totalorder %s30_s9, %s30_s9 }
   0x6   :  { %p38_p0 = scmp.ne.s32.totalorder %s30_s9, %s37_s10  ;;  %p43_p2 = scmp.lt.s32.totalorder %s37_s10, %s37_s10 }
   0x8   :  { %p44_p3 = por %p43_p2, %p42_p1 }
   0x9   :  { %v11_v1 = vld [vmem:[#allocation3] sm:$0x1]  }
   0xa   :  { %v8_v2 = vld [vmem:[#allocation3] sm:$0x1]   ;;  %12 = vrot.lane.b32.xlu0 %v11_v1, %s59_s0  ;;  %p45_p4 = pnand %p44_p3, %p38_p0 }
   0xb   :  { %10 = vst.msk [vmem:[#allocation2] sm:$0x1] %vm9_vm0, %v8_v2  }
  0x7c   :  { %v13_v3 = vpop.permute.xlu0 %12  }
  0x7d   :  { %16 = vst.msk [vmem:[#allocation2 + $0x1] sm:$0x1] %vm9_vm0, %v13_v3  }
  0x84   :  { %v21_v4 = vld [vmem:[#allocation2] sm:$0x3] }
  0x85   :  { %24 = vst [vmem:[#allocation0] sm:$0x3] %v21_v4 }
  0x86   :  { %48 = shalt.err (!%p45_p4)
}
  0x87   :  { %32 = dma.vmem_to_hbm [thread:$0]  %s30_s9, 32, %s78_s1, [#allocation1]  }
  0x88   :  { %57 = dma.done.wait [#allocation1], 32  }
  0x89   :  { %58 = vsyncadd [#allocation1], 4294967264 }
  0x8a   :  { %34 = vsyncpa [#allocation1], 1 }

// kernel: linear_predictor_forward.1
= control target key start
LH: loop header
LB: loop body
LE: loop exit
PB: predicated region body
PF: predicated region fallthrough
CT: control target
= control target key end

     0   :  { %vm36_vm0 = vcmask 1040384   ;;  %v217_v0 = vmov 0.0   ;;  %v218_v2 = vmov 0   ;;  %vm219_vm1 = vmmov 0   ;;  %s268_s1 = inlined_call_operand.vmem [shape: f32[33,2], index: 1, kind: input, shape index: {}]   ;;  %s269_s0 = inlined_call_operand.vmem [shape: f32[16,33], index: 0, kind: input, shape index: {}]   ;;  %s270_s2 = inlined_call_operand.<no memory space> [shape: f32[1,1], index: 2, kind: input, shape index: {}]   ;;  %s271_s3 = inlined_call_operand.vmem [shape: f32[1,16], index: 3, kind: output, shape index: {}]  }
   0x1   :  { %191 = vmatprep.subr.bf16.mxu0 %v217_v0  ;;  %v22_v1 = vld [vmem:[%s268_s1 + $0x20] sm:$0x1]  ;;  %v38_v3 = vsel %vm36_vm0, 65535, %v218_v2  ;;  %197 = vmatprep.mubr.msk.bf16.mxu0 %vm219_vm1, %v217_v0  ;;  %v20_v6 = vld [vmem:[%s268_s1 + $0x10] sm:$0xff]  ;;  %v21_v7 = vld [vmem:[%s268_s1 + $0x18] sm:$0xff]  ;;  %vm32_vm2 = vcmask 269312   ;;  %v172_v34 = vstv %s270_s2 }
   0x2   :  { %v25_v4 = vpack.c.bf16 %v22_v1, %v22_v1  ;;  %v16_v5 = vld [vmem:[%s269_s0] sm:$0xff]  ;;  %201 = vmatprep.subr.bf16.mxu1 %v217_v0  ;;  %207 = vmatprep.mubr.msk.bf16.mxu1 %vm219_vm1, %v217_v0  ;;  %v17_v8 = vld [vmem:[%s269_s0 + $0x8] sm:$0xff]  ;;  %v24_v11 = vpack.c.bf16 %v21_v7, %v20_v6  ;;  %s220_s0 = smov 127   ;;  %vm175_vm3 = vcmask 122880  }
   0x3   :  { %v26_v10 = vpack.c.bf16 %v17_v8, %v16_v5  ;;  %v18_v14 = vld [vmem:[%s268_s1] sm:$0xff]  ;;  %v19_v15 = vld [vmem:[%s268_s1 + $0x8] sm:$0xff] }
   0x4   :  { %v40_v9 = vand.u32 %v38_v3, %v25_v4  ;;  %v23_v18 = vpack.c.bf16 %v19_v15, %v18_v14 }
   0x5   :  { %v27_v12 = vunpack.c.l.bf16 %v26_v10  ;;  %v28_v13 = vunpack.c.h.bf16 %v26_v10 }
   0x6   :  { %192 = vmatpush3.bf16.msra.mxu0 %v40_v9  ;;  %202 = vmatpush3.bf16.msra.mxu1 %v40_v9 }
   0x7   :  { %193 = vmatprep.subr.bf16.mxu0 %v217_v0  ;;  %203 = vmatprep.subr.bf16.mxu1 %v217_v0  ;;  %v29_v16 = vsub.f32 %v16_v5, %v27_v12  ;;  %v30_v17 = vsub.f32 %v17_v8, %v28_v13 }
   0x9   :  { %v31_v19 = vpack.c.bf16 %v30_v17, %v29_v16 }
   0xa   :  { %194 = vmatpush3.bf16.msra.mxu0 %v24_v11  ;;  %204 = vmatpush3.bf16.msra.mxu1 %v24_v11 }
   0xb   :  { %195 = vmatprep.subr.bf16.mxu0 %v217_v0  ;;  %205 = vmatprep.subr.bf16.mxu1 %v217_v0 }
   0xe   :  { %196 = vmatpush3.bf16.msra.mxu0 %v23_v18  ;;  %206 = vmatpush3.bf16.msra.mxu1 %v23_v18 }
  0x11   :  { %198 = vmatmul.mubr.msk.bf16.vlgmr.msra.gmra.mxu0 %vm32_vm2, %v26_v10  ;;  %208 = vmatmul.mubr.msk.bf16.vlgmr.msra.gmra.mxu1 %vm32_vm2, %v31_v19 }
  0xd1   :  { %v76_v20 = vpop.f32.mrf.mxu0  ;;  %v120_v21 = vpop.f32.mrf.mxu1 }
  0xd2   :  { %129 = vrot.lane.b32.xlu0 %v76_v20, %s220_s0 }
  0xd3   :  { %v199_v22 = vpop.f32.mrf.mxu0  ;;  %v209_v23 = vpop.f32.mrf.mxu1 }
  0xd5   :  { %v79_v24 = vpop.f32.mrf.mxu0  ;;  %v123_v25 = vpop.f32.mrf.mxu1 }
  0xd6   :  { %131 = vrot.lane.b32.xlu0 %v79_v24, %s220_s0 }
  0xd7   :  { %v200_v26 = vpop.f32.mrf.mxu0  ;;  %v210_v27 = vpop.f32.mrf.mxu1 }
 0x144   :  { %v130_v28 = vpop.permute.xlu0 %129 }
 0x145   :  { %v135_v29 = vadd.f32 %v130_v28, %v76_v20 }
 0x147   :  { %v137_v30 = vadd.f32 %v135_v29, %v120_v21 }
 0x148   :  { %v132_v31 = vpop.permute.xlu0 %131 }
 0x149   :  { %v136_v32 = vadd.f32 %v132_v31, %v79_v24  ;;  %139 = vxpose.xlu1.b32.start [1/2] (short) (narrow) %v137_v30, 8 }
 0x14b   :  { %v138_v33 = vadd.f32 %v136_v32, %v123_v25 }
 0x14d   :  { %140 = vxpose.xlu1.b32.end [2/2] (short) (narrow) %v138_v33, 8 }
 0x1c5   :  { %v155_v35 = vpop.trf.xlu1 }
 0x1c6   :  { %v173_v36 = vadd.f32 %v172_v34, %v155_v35 }
 0x1c8   :  { %215 = vtanh.f32 %v173_v36 }
 0x1d5   :  { %v216_v37 = vpop.eup %215 }
 0x1d6   :  { %176 = vst.msk [vmem:[%s271_s3] sm:$0x1] %vm175_vm3, %v216_v37 }

</bundles_post_ra>
